<compile_context>
chip_gen: v5e
topology: v5e:2x2
jax: 0.10.0
libtpu: 0.0.40
codegen_flags: <defaults>
</compile_context>

<pallas_src>
import functools

import jax
import jax.numpy as jnp
from jax.experimental import pallas as pl
from jax.experimental.pallas import tpu as pltpu

BN_EPS = 1e-5
TN_TARGET = 512                   # lane-tile target (multiple of 128)
VMEM_LIMIT = 32 * 1024 * 1024     # safe scoped-VMEM limit on v5e / v6e / v7x
# TODO(synk): on v7x verify with a trace that "parallel" really splits the
# (B, N-tile) grid across both TensorCores (else switch that axis to
# pltpu.CORE_PARALLEL); on v5e/v6e vmem_limit / TN_TARGET could be raised.


def _round_up(x, m):
    return ((x + m - 1) // m) * m


def _choose_n_tile(n, target=TN_TARGET):
    """Pick (tn, n_pad): lane tile (multiple of 128 when tiled) and padded N."""
    assert target % 128 == 0
    if n <= target:
        return n, n               # one full-extent tile per batch row, no padding
    return target, _round_up(n, target)


# --------------------------------- kernels ----------------------------------


def _mm_and_stats(h, w_ref, y_ref, stats_ref):
    """y = W @ h on the MXU (f32 accumulation) + lane-dense per-tile moments."""
    y = jnp.dot(w_ref[...].astype(h.dtype), h,
                preferred_element_type=jnp.float32)          # [Cout_p, tn] f32
    # Lane-dense stats block: [1, 1, 2, Cout_p] = (sum, sum of squares).
    stats_ref[0, 0, 0] = jnp.sum(y, axis=1)
    stats_ref[0, 0, 1] = jnp.sum(y * y, axis=1)
    y_ref[0] = y.astype(y_ref.dtype)


def _first_layer_kernel(x_ref, w_ref, y_ref, stats_ref, *, mxu_dtype):
    # x is consumed in its native [B, Cin, N] layout; any zero-padded columns
    # (bias-free conv) contribute exactly 0 to the batch statistics.
    _mm_and_stats(x_ref[0].astype(mxu_dtype), w_ref, y_ref, stats_ref)


def _mid_layer_kernel(x_ref, w_ref, scale_ref, shift_ref, y_ref, stats_ref, *,
                      mxu_dtype, tn, n_valid, n_pad):
    # Prologue: previous layer's BN+ReLU folded into one scale/shift FMA (f32).
    h = x_ref[0].astype(jnp.float32)
    h = jnp.maximum(h * scale_ref[...] + shift_ref[...], 0.0)
    if n_pad != n_valid:   # static: mask only generated when N padding exists
        col = pl.program_id(1) * tn + jax.lax.broadcasted_iota(
            jnp.int32, (1, tn), 1)
        h = jnp.where(col < n_valid, h, 0.0)
    _mm_and_stats(h.astype(mxu_dtype), w_ref, y_ref, stats_ref)


def _finalize_kernel(y_ref, scale_ref, shift_ref, o_ref, *, cout):
    y = y_ref[0].astype(jnp.float32)
    res = jnp.maximum(y * scale_ref[...] + shift_ref[...], 0.0)
    if cout != y.shape[0]:       # drop padded channels when storing
        res = res[:cout]
    o_ref[0] = res.astype(o_ref.dtype)


# ----------------------------- pallas_call wrappers -------------------------


def _layer_call(h, wT, scale, shift, *, tn, n_valid, act_dtype, mxu_dtype):
    B, cin_dim, n_pad = h.shape
    cout_p = wT.shape[0]
    nj = n_pad // tn
    act_bytes = 2 if act_dtype == jnp.bfloat16 else 4
    cost = pl.CostEstimate(
        flops=2 * B * n_pad * cin_dim * cout_p,
        transcendentals=0,
        bytes_accessed=(h.dtype.itemsize * B * cin_dim * n_pad
                        + act_bytes * B * cout_p * n_pad
                        + wT.dtype.itemsize * cout_p * cin_dim
                        + 4 * (B * nj * 2 * cout_p + 2 * cin_dim)),
    )

    x_spec = pl.BlockSpec((1, cin_dim, tn), lambda b, j: (b, 0, j))
    # NOTE: w/scale/shift blocks are grid-invariant; pipeline_mode=pl.Buffered(1)
    # would save their double-buffer VMEM on v7x's 64 MiB budget.
    w_spec = pl.BlockSpec((cout_p, cin_dim), lambda b, j: (0, 0))
    vec_spec = pl.BlockSpec((cin_dim, 1), lambda b, j: (0, 0))
    out_specs = [pl.BlockSpec((1, cout_p, tn), lambda b, j: (b, 0, j)),
                 pl.BlockSpec((1, 1, 2, cout_p), lambda b, j: (b, j, 0, 0))]
    out_shape = [jax.ShapeDtypeStruct((B, cout_p, n_pad), act_dtype),
                 jax.ShapeDtypeStruct((B, nj, 2, cout_p), jnp.float32)]

    if scale is None:
        kernel = functools.partial(_first_layer_kernel, mxu_dtype=mxu_dtype)
        in_specs = [x_spec, w_spec]
        args = (h, wT)
    else:
        kernel = functools.partial(_mid_layer_kernel, mxu_dtype=mxu_dtype,
                                   tn=tn, n_valid=n_valid, n_pad=n_pad)
        in_specs = [x_spec, w_spec, vec_spec, vec_spec]
        args = (h, wT, scale, shift)

    return pl.pallas_call(
        kernel,
        grid=(B, nj),
        in_specs=in_specs,
        out_specs=out_specs,
        out_shape=out_shape,
        compiler_params=pltpu.CompilerParams(
            dimension_semantics=("parallel", "parallel"),
            vmem_limit_bytes=VMEM_LIMIT),
        cost_estimate=cost,
    )(*args)


def _finalize_call(h, scale, shift, *, cout, tn, out_dtype):
    B, cout_p, n_pad = h.shape
    nj = n_pad // tn
    out_bytes = 2 if out_dtype == jnp.bfloat16 else 4
    cost = pl.CostEstimate(
        flops=2 * B * cout_p * n_pad,
        transcendentals=0,
        bytes_accessed=(h.dtype.itemsize * B * cout_p * n_pad
                        + out_bytes * B * cout * n_pad + 8 * cout_p),
    )
    return pl.pallas_call(
        functools.partial(_finalize_kernel, cout=cout),
        grid=(B, nj),
        in_specs=[pl.BlockSpec((1, cout_p, tn), lambda b, j: (b, 0, j)),
                  pl.BlockSpec((cout_p, 1), lambda b, j: (0, 0)),
                  pl.BlockSpec((cout_p, 1), lambda b, j: (0, 0))],
        out_specs=pl.BlockSpec((1, cout, tn), lambda b, j: (b, 0, j)),
        out_shape=jax.ShapeDtypeStruct((B, cout, n_pad), out_dtype),
        compiler_params=pltpu.CompilerParams(
            dimension_semantics=("parallel", "parallel"),
            vmem_limit_bytes=VMEM_LIMIT),
        cost_estimate=cost,
    )(h, scale, shift)


# ------------------------------ model wrapper --------------------------------


def init_mlp_params(key, nch_input, nch_layers):
    """Deterministic init (uniform +-1/sqrt(fan_in), PyTorch-default style)."""
    params = []
    last = nch_input
    for outp in nch_layers:
        key, kw, kb = jax.random.split(key, 3)
        bound = 1.0 / jnp.sqrt(jnp.float32(last))
        w = jax.random.uniform(kw, (last, outp), jnp.float32, -bound, bound)
        b = jax.random.uniform(kb, (outp,), jnp.float32, -bound, bound)
        gamma = jnp.ones((outp,), jnp.float32)   # BN weight
        beta = jnp.zeros((outp,), jnp.float32)   # BN bias
        params.append((w, b, gamma, beta))
        last = outp
    return params


def prepare_mlp_params(params, act_dtype=jnp.bfloat16):
    """One-time weight relayout (pad + transpose + cast) hoisted out of the
    per-call forward.  Returns [(wT[Cout_p, Cin_p] in act_dtype, gamma, beta)].
    The conv bias is intentionally dropped: training-mode BN subtracts the
    batch mean, so the bias cancels exactly.
    """
    cpad = 16 if act_dtype == jnp.bfloat16 else 8   # bf16 vregs pack 16 sublanes
    prepped = []
    cin_p = None
    first = True
    for (w, b, gamma, beta) in params:
        cin, cout = w.shape
        cout_p = _round_up(cout, cpad)
        if first:
            cin_p = cin          # layer 0 consumes raw x channels, unpadded
            first = False
        wT = jnp.zeros((cout_p, cin_p), jnp.float32)
        wT = wT.at[:cout, :cin].set(w.T).astype(act_dtype)
        prepped.append((wT, gamma.astype(jnp.float32), beta.astype(jnp.float32)))
        cin_p = cout_p
    return prepped


def mlp_net_forward(x, prepped, act_dtype=jnp.bfloat16, out_dtype=None,
                    tn_target=TN_TARGET):
    """x: [B, Cin, N] -> [B, Cout, N]  (b_shared=True path, training-mode BN)."""
    # TODO(synk): the non-shared (nn.Linear, 2-D input) path with dropout>0 and
    # BN running-stat (momentum) buffer updates are not implemented here.
    B, cin, N = x.shape
    if out_dtype is None:
        out_dtype = x.dtype
    tn, n_pad = _choose_n_tile(N, tn_target)
    # bf16 MXU dots only on a real TPU backend (CPU interpret lacks bf16 dot).
    on_tpu = jax.default_backend() == "tpu"
    mxu_dtype = jnp.bfloat16 if (on_tpu and act_dtype == jnp.bfloat16) else jnp.float32

    h = x
    if n_pad != N:   # rare: only when N > tile target and not tile-divisible
        h = jnp.pad(h, ((0, 0), (0, 0), (0, n_pad - N)))
    m_valid = B * N

    scale = shift = None
    cout = cin
    for (wT, gamma, beta) in prepped:
        cout_p = wT.shape[0]
        cout = gamma.shape[0]
        h, stats = _layer_call(h, wT, scale, shift, tn=tn, n_valid=N,
                               act_dtype=act_dtype, mxu_dtype=mxu_dtype)
        # Cross-tile reduction of (sum, sumsq) partials + BN affine fold.
        tot = jnp.sum(stats, axis=(0, 1))                  # [2, Cout_p]
        mean = tot[0] / m_valid
        # TODO(synk): single-pass E[y^2]-mean^2 in f32 can cancel if |mean|>>std
        # at very large B*N; switch to shifted moments if used for training.
        var = jnp.maximum(tot[1] / m_valid - mean * mean, 0.0)
        gamma_p = jnp.pad(gamma, (0, cout_p - cout))
        beta_p = jnp.pad(beta, (0, cout_p - cout))
        s_vec = gamma_p * jax.lax.rsqrt(var + BN_EPS)
        scale = s_vec[:, None]
        shift = (beta_p - mean * s_vec)[:, None]

    out = _finalize_call(h, scale, shift, cout=cout, tn=tn, out_dtype=out_dtype)
    if n_pad != N:
        out = out[:, :, :N]
    return out


def mlp_net_reference(x, params):
    """Pure-JAX reference (faithful to the PyTorch module, incl. conv bias)."""
    B, cin, N = x.shape
    h = jnp.transpose(x, (0, 2, 1)).reshape(B * N, cin).astype(jnp.float32)
    for (w, b, gamma, beta) in params:
        y = h @ w + b
        mean = jnp.mean(y, axis=0, keepdims=True)
        var = jnp.mean((y - mean) ** 2, axis=0, keepdims=True)
        y = (y - mean) * jax.lax.rsqrt(var + BN_EPS) * gamma + beta
        h = jnp.maximum(y, 0.0)
    cout = h.shape[1]
    return jnp.transpose(h.reshape(B, N, cout), (0, 2, 1))


if __name__ == "__main__":
    key = jax.random.PRNGKey(0)
    key, kx, kp = jax.random.split(key, 3)

    B, Cin, N = 2, 4, 16
    nch_layers = [32, 64]

    x = jax.random.normal(kx, (B, Cin, N), jnp.float32)
    params = init_mlp_params(kp, Cin, nch_layers)
    ref = mlp_net_reference(x, params)

    # f32 activation path: matches the reference to tight tolerance.
    prepped_f32 = prepare_mlp_params(params, act_dtype=jnp.float32)
    fwd_f32 = jax.jit(functools.partial(mlp_net_forward, act_dtype=jnp.float32))
    out_f32 = jax.block_until_ready(fwd_f32(x, prepped_f32))
    assert out_f32.shape == (B, nch_layers[-1], N), out_f32.shape
    assert jnp.allclose(out_f32, ref, atol=1e-4, rtol=1e-4), \
        "f32 kernel mismatch vs reference"

    # bf16 inter-layer activations + bf16 final store (HBM-traffic optimized).
    prepped_bf16 = prepare_mlp_params(params, act_dtype=jnp.bfloat16)
    fwd_bf16 = jax.jit(functools.partial(mlp_net_forward,
                                         act_dtype=jnp.bfloat16,
                                         out_dtype=jnp.bfloat16))
    out_bf16 = jax.block_until_ready(fwd_bf16(x, prepped_bf16))
    assert out_bf16.shape == (B, nch_layers[-1], N), out_bf16.shape
    assert jnp.allclose(out_bf16.astype(jnp.float32), ref, atol=6e-2, rtol=5e-2), \
        "bf16 kernel mismatch vs reference"

    print("KERNEL_OK")
</pallas_src>

<mosaic_0001>
module attributes {stable_mosaic.version = 11 : i64} {
  func.func @_first_layer_kernel(%arg0: i32, %arg1: i32, %arg2: memref<1x4x16xf32, #tpu.memory_space<vmem>>, %arg3: memref<32x4xf32, #tpu.memory_space<vmem>>, %arg4: memref<1x32x16xf32, #tpu.memory_space<vmem>>, %arg5: memref<1x1x2x32xf32, #tpu.memory_space<vmem>>) attributes {dimension_semantics = [#tpu.dimension_semantics<parallel>, #tpu.dimension_semantics<parallel>], iteration_bounds = array<i64: 2, 1>, scalar_prefetch = 0 : i64, scratch_operands = 0 : i64, tpu.core_type = #tpu.core_type<tc>, window_params = [{transform_indices = @transform_0, window_bounds = array<i64: 1, 4, 16>}, {pipeline_mode = #tpu.pipeline_mode<synchronous>, transform_indices = @transform_1, window_bounds = array<i64: 32, 4>}, {transform_indices = @transform_2, window_bounds = array<i64: 1, 32, 16>}, {transform_indices = @transform_3, window_bounds = array<i64: 1, 1, 2, 32>}]} {
    %c0 = arith.constant 0 : index
    %c0_0 = arith.constant 0 : index
    %c0_1 = arith.constant 0 : index
    %0 = vector.load %arg2[%c0, %c0_0, %c0_1] : memref<1x4x16xf32, #tpu.memory_space<vmem>>, vector<1x4x16xf32>
    %1 = vector.shape_cast %0 : vector<1x4x16xf32> to vector<4x16xf32>
    %c0_2 = arith.constant 0 : index
    %c0_3 = arith.constant 0 : index
    %2 = vector.load %arg3[%c0_2, %c0_3] : memref<32x4xf32, #tpu.memory_space<vmem>>, vector<32x4xf32>
    %cst = arith.constant dense<0.000000e+00> : vector<32x16xf32>
    %3 = tpu.matmul %2, %1, %cst {dimension_numbers = #tpu.dot_dimension_numbers<[1], [0], [0], [1], [0, 0, 1, 1], [], []>} : vector<32x4xf32>, vector<4x16xf32>, vector<32x16xf32> -> vector<32x16xf32>
    %cst_4 = arith.constant dense<0.000000e+00> : vector<32xf32>
    %4 = vector.multi_reduction <add>, %3, %cst_4 [1] : vector<32x16xf32> to vector<32xf32>
    %c0_5 = arith.constant 0 : index
    %c0_6 = arith.constant 0 : index
    %c0_7 = arith.constant 0 : index
    %c0_8 = arith.constant 0 : index
    %5 = vector.load %arg5[%c0_5, %c0_6, %c0_7, %c0_8] : memref<1x1x2x32xf32, #tpu.memory_space<vmem>>, vector<1x1x1x32xf32>
    %6 = vector.shape_cast %5 : vector<1x1x1x32xf32> to vector<32xf32>
    %7 = vector.shape_cast %4 : vector<32xf32> to vector<1x1x1x32xf32>
    tpu.vector_store %arg5[%c0_5, %c0_6, %c0_7, %c0_8], %7 {strides = array<i32>} : memref<1x1x2x32xf32, #tpu.memory_space<vmem>>, vector<1x1x1x32xf32>,
    %8 = arith.mulf %3, %3 : vector<32x16xf32>
    %cst_9 = arith.constant dense<0.000000e+00> : vector<32xf32>
    %9 = vector.multi_reduction <add>, %8, %cst_9 [1] : vector<32x16xf32> to vector<32xf32>
    %c0_10 = arith.constant 0 : index
    %c0_11 = arith.constant 0 : index
    %c1 = arith.constant 1 : index
    %c0_12 = arith.constant 0 : index
    %10 = vector.load %arg5[%c0_10, %c0_11, %c1, %c0_12] : memref<1x1x2x32xf32, #tpu.memory_space<vmem>>, vector<1x1x1x32xf32>
    %11 = vector.shape_cast %10 : vector<1x1x1x32xf32> to vector<32xf32>
    %12 = vector.shape_cast %9 : vector<32xf32> to vector<1x1x1x32xf32>
    tpu.vector_store %arg5[%c0_10, %c0_11, %c1, %c0_12], %12 {strides = array<i32>} : memref<1x1x2x32xf32, #tpu.memory_space<vmem>>, vector<1x1x1x32xf32>,
    %c0_13 = arith.constant 0 : index
    %c0_14 = arith.constant 0 : index
    %c0_15 = arith.constant 0 : index
    %13 = vector.load %arg4[%c0_13, %c0_14, %c0_15] : memref<1x32x16xf32, #tpu.memory_space<vmem>>, vector<1x32x16xf32>
    %14 = vector.shape_cast %13 : vector<1x32x16xf32> to vector<32x16xf32>
    %15 = vector.shape_cast %3 : vector<32x16xf32> to vector<1x32x16xf32>
    tpu.vector_store %arg4[%c0_13, %c0_14, %c0_15], %15 {strides = array<i32>} : memref<1x32x16xf32, #tpu.memory_space<vmem>>, vector<1x32x16xf32>,
    return
  }
  func.func @transform_0(%arg0: i32, %arg1: i32) -> (i32, i32, i32) {
    %c0_i32 = arith.constant 0 : i32
    %c0_i32_0 = arith.constant 0 : i32
    return %arg0, %c0_i32, %arg1 : i32, i32, i32
  }
  func.func @transform_1(%arg0: i32, %arg1: i32) -> (i32, i32) {
    %c0_i32 = arith.constant 0 : i32
    %c0_i32_0 = arith.constant 0 : i32
    %c0_i32_1 = arith.constant 0 : i32
    return %c0_i32, %c0_i32_0 : i32, i32
  }
  func.func @transform_2(%arg0: i32, %arg1: i32) -> (i32, i32, i32) {
    %c0_i32 = arith.constant 0 : i32
    %c0_i32_0 = arith.constant 0 : i32
    return %arg0, %c0_i32, %arg1 : i32, i32, i32
  }
  func.func @transform_3(%arg0: i32, %arg1: i32) -> (i32, i32, i32, i32) {
    %c0_i32 = arith.constant 0 : i32
    %c0_i32_0 = arith.constant 0 : i32
    %c0_i32_1 = arith.constant 0 : i32
    return %arg0, %arg1, %c0_i32, %c0_i32_0 : i32, i32, i32, i32
  }
}

module attributes {stable_mosaic.version = 11 : i64} {
  func.func @_mid_layer_kernel(%arg0: i32, %arg1: i32, %arg2: memref<1x32x16xf32, #tpu.memory_space<vmem>>, %arg3: memref<64x32xf32, #tpu.memory_space<vmem>>, %arg4: memref<32x1xf32, #tpu.memory_space<vmem>>, %arg5: memref<32x1xf32, #tpu.memory_space<vmem>>, %arg6: memref<1x64x16xf32, #tpu.memory_space<vmem>>, %arg7: memref<1x1x2x64xf32, #tpu.memory_space<vmem>>) attributes {dimension_semantics = [#tpu.dimension_semantics<parallel>, #tpu.dimension_semantics<parallel>], iteration_bounds = array<i64: 2, 1>, scalar_prefetch = 0 : i64, scratch_operands = 0 : i64, tpu.core_type = #tpu.core_type<tc>, window_params = [{transform_indices = @transform_0, window_bounds = array<i64: 1, 32, 16>}, {pipeline_mode = #tpu.pipeline_mode<synchronous>, transform_indices = @transform_1, window_bounds = array<i64: 64, 32>}, {pipeline_mode = #tpu.pipeline_mode<synchronous>, transform_indices = @transform_2, window_bounds = array<i64: 32, 1>}, {pipeline_mode = #tpu.pipeline_mode<synchronous>, transform_indices = @transform_3, window_bounds = array<i64: 32, 1>}, {transform_indices = @transform_4, window_bounds = array<i64: 1, 64, 16>}, {transform_indices = @transform_5, window_bounds = array<i64: 1, 1, 2, 64>}]} {
    %c0 = arith.constant 0 : index
    %c0_0 = arith.constant 0 : index
    %c0_1 = arith.constant 0 : index
    %0 = vector.load %arg2[%c0, %c0_0, %c0_1] : memref<1x32x16xf32, #tpu.memory_space<vmem>>, vector<1x32x16xf32>
    %1 = vector.shape_cast %0 : vector<1x32x16xf32> to vector<32x16xf32>
    %c0_2 = arith.constant 0 : index
    %c0_3 = arith.constant 0 : index
    %2 = vector.load %arg4[%c0_2, %c0_3] : memref<32x1xf32, #tpu.memory_space<vmem>>, vector<32x1xf32>
    %3 = vector.broadcast %2 : vector<32x1xf32> to vector<32x16xf32>
    %4 = arith.mulf %1, %3 : vector<32x16xf32>
    %c0_4 = arith.constant 0 : index
    %c0_5 = arith.constant 0 : index
    %5 = vector.load %arg5[%c0_4, %c0_5] : memref<32x1xf32, #tpu.memory_space<vmem>>, vector<32x1xf32>
    %6 = vector.broadcast %5 : vector<32x1xf32> to vector<32x16xf32>
    %7 = arith.addf %4, %6 : vector<32x16xf32>
    %cst = arith.constant 0.000000e+00 : f32
    %8 = vector.broadcast %cst : f32 to vector<32x16xf32>
    %9 = arith.maximumf %7, %8 : vector<32x16xf32>
    %c0_6 = arith.constant 0 : index
    %c0_7 = arith.constant 0 : index
    %10 = vector.load %arg3[%c0_6, %c0_7] : memref<64x32xf32, #tpu.memory_space<vmem>>, vector<64x32xf32>
    %cst_8 = arith.constant dense<0.000000e+00> : vector<64x16xf32>
    %11 = tpu.matmul %10, %9, %cst_8 {dimension_numbers = #tpu.dot_dimension_numbers<[1], [0], [0], [1], [0, 0, 1, 1], [], []>} : vector<64x32xf32>, vector<32x16xf32>, vector<64x16xf32> -> vector<64x16xf32>
    %cst_9 = arith.constant dense<0.000000e+00> : vector<64xf32>
    %12 = vector.multi_reduction <add>, %11, %cst_9 [1] : vector<64x16xf32> to vector<64xf32>
    %c0_10 = arith.constant 0 : index
    %c0_11 = arith.constant 0 : index
    %c0_12 = arith.constant 0 : index
    %c0_13 = arith.constant 0 : index
    %13 = vector.load %arg7[%c0_10, %c0_11, %c0_12, %c0_13] : memref<1x1x2x64xf32, #tpu.memory_space<vmem>>, vector<1x1x1x64xf32>
    %14 = vector.shape_cast %13 : vector<1x1x1x64xf32> to vector<64xf32>
    %15 = vector.shape_cast %12 : vector<64xf32> to vector<1x1x1x64xf32>
    tpu.vector_store %arg7[%c0_10, %c0_11, %c0_12, %c0_13], %15 {strides = array<i32>} : memref<1x1x2x64xf32, #tpu.memory_space<vmem>>, vector<1x1x1x64xf32>,
    %16 = arith.mulf %11, %11 : vector<64x16xf32>
    %cst_14 = arith.constant dense<0.000000e+00> : vector<64xf32>
    %17 = vector.multi_reduction <add>, %16, %cst_14 [1] : vector<64x16xf32> to vector<64xf32>
    %c0_15 = arith.constant 0 : index
    %c0_16 = arith.constant 0 : index
    %c1 = arith.constant 1 : index
    %c0_17 = arith.constant 0 : index
    %18 = vector.load %arg7[%c0_15, %c0_16, %c1, %c0_17] : memref<1x1x2x64xf32, #tpu.memory_space<vmem>>, vector<1x1x1x64xf32>
    %19 = vector.shape_cast %18 : vector<1x1x1x64xf32> to vector<64xf32>
    %20 = vector.shape_cast %17 : vector<64xf32> to vector<1x1x1x64xf32>
    tpu.vector_store %arg7[%c0_15, %c0_16, %c1, %c0_17], %20 {strides = array<i32>} : memref<1x1x2x64xf32, #tpu.memory_space<vmem>>, vector<1x1x1x64xf32>,
    %c0_18 = arith.constant 0 : index
    %c0_19 = arith.constant 0 : index
    %c0_20 = arith.constant 0 : index
    %21 = vector.load %arg6[%c0_18, %c0_19, %c0_20] : memref<1x64x16xf32, #tpu.memory_space<vmem>>, vector<1x64x16xf32>
    %22 = vector.shape_cast %21 : vector<1x64x16xf32> to vector<64x16xf32>
    %23 = vector.shape_cast %11 : vector<64x16xf32> to vector<1x64x16xf32>
    tpu.vector_store %arg6[%c0_18, %c0_19, %c0_20], %23 {strides = array<i32>} : memref<1x64x16xf32, #tpu.memory_space<vmem>>, vector<1x64x16xf32>,
    return
  }
  func.func @transform_0(%arg0: i32, %arg1: i32) -> (i32, i32, i32) {
    %c0_i32 = arith.constant 0 : i32
    %c0_i32_0 = arith.constant 0 : i32
    return %arg0, %c0_i32, %arg1 : i32, i32, i32
  }
  func.func @transform_1(%arg0: i32, %arg1: i32) -> (i32, i32) {
    %c0_i32 = arith.constant 0 : i32
    %c0_i32_0 = arith.constant 0 : i32
    %c0_i32_1 = arith.constant 0 : i32
    return %c0_i32, %c0_i32_0 : i32, i32
  }
  func.func @transform_2(%arg0: i32, %arg1: i32) -> (i32, i32) {
    %c0_i32 = arith.constant 0 : i32
    %c0_i32_0 = arith.constant 0 : i32
    %c0_i32_1 = arith.constant 0 : i32
    return %c0_i32, %c0_i32_0 : i32, i32
  }
  func.func @transform_3(%arg0: i32, %arg1: i32) -> (i32, i32) {
    %c0_i32 = arith.constant 0 : i32
    %c0_i32_0 = arith.constant 0 : i32
    %c0_i32_1 = arith.constant 0 : i32
    return %c0_i32, %c0_i32_0 : i32, i32
  }
  func.func @transform_4(%arg0: i32, %arg1: i32) -> (i32, i32, i32) {
    %c0_i32 = arith.constant 0 : i32
    %c0_i32_0 = arith.constant 0 : i32
    return %arg0, %c0_i32, %arg1 : i32, i32, i32
  }
  func.func @transform_5(%arg0: i32, %arg1: i32) -> (i32, i32, i32, i32) {
    %c0_i32 = arith.constant 0 : i32
    %c0_i32_0 = arith.constant 0 : i32
    %c0_i32_1 = arith.constant 0 : i32
    return %arg0, %arg1, %c0_i32, %c0_i32_0 : i32, i32, i32, i32
  }
}

module attributes {stable_mosaic.version = 11 : i64} {
  func.func @_finalize_kernel(%arg0: i32, %arg1: i32, %arg2: memref<1x64x16xf32, #tpu.memory_space<vmem>>, %arg3: memref<64x1xf32, #tpu.memory_space<vmem>>, %arg4: memref<64x1xf32, #tpu.memory_space<vmem>>, %arg5: memref<1x64x16xf32, #tpu.memory_space<vmem>>) attributes {dimension_semantics = [#tpu.dimension_semantics<parallel>, #tpu.dimension_semantics<parallel>], iteration_bounds = array<i64: 2, 1>, scalar_prefetch = 0 : i64, scratch_operands = 0 : i64, tpu.core_type = #tpu.core_type<tc>, window_params = [{transform_indices = @transform_0, window_bounds = array<i64: 1, 64, 16>}, {pipeline_mode = #tpu.pipeline_mode<synchronous>, transform_indices = @transform_1, window_bounds = array<i64: 64, 1>}, {pipeline_mode = #tpu.pipeline_mode<synchronous>, transform_indices = @transform_2, window_bounds = array<i64: 64, 1>}, {transform_indices = @transform_3, window_bounds = array<i64: 1, 64, 16>}]} {
    %c0 = arith.constant 0 : index
    %c0_0 = arith.constant 0 : index
    %c0_1 = arith.constant 0 : index
    %0 = vector.load %arg2[%c0, %c0_0, %c0_1] : memref<1x64x16xf32, #tpu.memory_space<vmem>>, vector<1x64x16xf32>
    %1 = vector.shape_cast %0 : vector<1x64x16xf32> to vector<64x16xf32>
    %c0_2 = arith.constant 0 : index
    %c0_3 = arith.constant 0 : index
    %2 = vector.load %arg3[%c0_2, %c0_3] : memref<64x1xf32, #tpu.memory_space<vmem>>, vector<64x1xf32>
    %3 = vector.broadcast %2 : vector<64x1xf32> to vector<64x16xf32>
    %4 = arith.mulf %1, %3 : vector<64x16xf32>
    %c0_4 = arith.constant 0 : index
    %c0_5 = arith.constant 0 : index
    %5 = vector.load %arg4[%c0_4, %c0_5] : memref<64x1xf32, #tpu.memory_space<vmem>>, vector<64x1xf32>
    %6 = vector.broadcast %5 : vector<64x1xf32> to vector<64x16xf32>
    %7 = arith.addf %4, %6 : vector<64x16xf32>
    %cst = arith.constant 0.000000e+00 : f32
    %8 = vector.broadcast %cst : f32 to vector<64x16xf32>
    %9 = arith.maximumf %7, %8 : vector<64x16xf32>
    %c0_6 = arith.constant 0 : index
    %c0_7 = arith.constant 0 : index
    %c0_8 = arith.constant 0 : index
    %10 = vector.load %arg5[%c0_6, %c0_7, %c0_8] : memref<1x64x16xf32, #tpu.memory_space<vmem>>, vector<1x64x16xf32>
    %11 = vector.shape_cast %10 : vector<1x64x16xf32> to vector<64x16xf32>
    %12 = vector.shape_cast %9 : vector<64x16xf32> to vector<1x64x16xf32>
    tpu.vector_store %arg5[%c0_6, %c0_7, %c0_8], %12 {strides = array<i32>} : memref<1x64x16xf32, #tpu.memory_space<vmem>>, vector<1x64x16xf32>,
    return
  }
  func.func @transform_0(%arg0: i32, %arg1: i32) -> (i32, i32, i32) {
    %c0_i32 = arith.constant 0 : i32
    %c0_i32_0 = arith.constant 0 : i32
    return %arg0, %c0_i32, %arg1 : i32, i32, i32
  }
  func.func @transform_1(%arg0: i32, %arg1: i32) -> (i32, i32) {
    %c0_i32 = arith.constant 0 : i32
    %c0_i32_0 = arith.constant 0 : i32
    %c0_i32_1 = arith.constant 0 : i32
    return %c0_i32, %c0_i32_0 : i32, i32
  }
  func.func @transform_2(%arg0: i32, %arg1: i32) -> (i32, i32) {
    %c0_i32 = arith.constant 0 : i32
    %c0_i32_0 = arith.constant 0 : i32
    %c0_i32_1 = arith.constant 0 : i32
    return %c0_i32, %c0_i32_0 : i32, i32
  }
  func.func @transform_3(%arg0: i32, %arg1: i32) -> (i32, i32, i32) {
    %c0_i32 = arith.constant 0 : i32
    %c0_i32_0 = arith.constant 0 : i32
    return %arg0, %c0_i32, %arg1 : i32, i32, i32
  }
}

</mosaic_0001>

<bundles_post_ra>
// kernel: mlp_net_forward.3
= control target key start
LH: loop header
LB: loop body
LE: loop exit
PB: predicated region body
PF: predicated region fallthrough
CT: control target
= control target key end

     0   :  { %s546_s12 = smov 0   ;;  %s548_s13 = smov 0   ;;  %s613_s0 = inlined_call_operand.vmem [shape: f32[2,4,16], index: 0, kind: input, shape index: {}]   ;;  %s614_s1 = inlined_call_operand.vmem [shape: f32[32,4], index: 1, kind: input, shape index: {}]   ;;  %s615_s2 = inlined_call_operand.vmem [shape: f32[2,32,16], index: 2, kind: output, shape index: {0}]   ;;  %s616_s3 = inlined_call_operand.vmem [shape: f32[2,1,2,32], index: 3, kind: output, shape index: {1}]  }
   0x1   :  { %s550_s14 = smov 0  }
   0x2 LB: > { %s26_s15 = sadd.s32 1, %s520_s13  ;;  %p462_p0 = scmp.ge.s32.totalorder %s524_s14, 1  ;;  %s524_s14 = sphi %s550_s14, %s14_s14   ;;  %s520_s13 = sphi %s548_s13, %s618_s13   ;;  %s516_s12 = sphi %s546_s12, %s617_s12  }
   0x3   : > { %p28_p1 = scmp.ge.s32.totalorder %s26_s15, 2  ;;  %p160_p2 = scmp.lt.s32.totalorder %s524_s14, 3 }
   0x5   : > { %s620_s15 = smov (%p28_p1, %s26_s15), 0  ;;  %p161_p3 = pnand %p462_p0, %p160_p2 }
   0x6   : > { %p196_p4 = scmp.lt.s32.totalorder (!%p161_p3), %s516_s12, 1 }
   0x7   : > { %164 = sbr.rel (%p161_p3) target bundleno = 282 (0x11a), region = 28 }
   0xc   : > { %s622_s12 = smov (!%p196_p4, %s516_s12), 1  ;;  %vm236_vm0 = vcmask 1043456   ;;  %v219_v0 = vld [vmem:[%s614_s1] sm:$0xff]  ;;  %vm223_vm1 = vcmask 31744   ;;  %v221_v1 = vld [vmem:[%s614_s1 + $0x10] sm:$0xff]  ;;  %v220_v3 = vld [vmem:[%s614_s1 + $0x8] sm:$0xff]  ;;  %v286_v22 = vlaneseq }
   0xd   : > { %s463_s16 = sshll.u32 %s622_s12, 2  ;;  %v222_v4 = vld [vmem:[%s614_s1 + $0x18] sm:$0xff]  ;;  %s474_s28 = sshll.u32 %s622_s12, 5  ;;  %vm269_vm2 = vcmask 130048   ;;  %vm291_vm3 = vcmask 130112   ;;  %vm295_vm4 = vcmask 195712  }
   0xe   : > { %s202_s19 = scalar_lea.vmem %s613_s0, %s463_s16  ;;  %s210_s4 = scalar_lea.vmem %s615_s2, %s474_s28  ;;  %v287_v24 = vand.u32 127, %v286_v22  ;;  %vm299_vm5 = vcmask 261312   ;;  %vm302_vm6 = vcmask 253952  }
   0xf   : > { %v218_v2 = vld [vmem:[%s202_s19] sm:$0xf]  ;;  %s466_s5 = sshll.u32 %s622_s12, 1 }
  0x10   : > { %467 = vmatpush.msk.msra.mxu0 %vm236_vm0, %v218_v2  ;;  %476 = vmatpush.msk.msra.mxu2 %vm236_vm0, %v218_v2  ;;  %v289_v26 = vadd.s32 4294967288, %v287_v24  ;;  %v293_v28 = vadd.s32 4294967280, %v287_v24  ;;  %v297_v32 = vadd.s32 4294967272, %v287_v24  ;;  %s217_s8 = scalar_lea.vmem %s616_s3, %s466_s5 }
  0x11   : > { %468 = vmatmul.msk.f32.vlgmr.msra.gmra.mxu0 %vm223_vm1, %v219_v0  ;;  %470 = vmatmul.msk.f32.vlgmr.msra.gmra.mxu2 %vm223_vm1, %v221_v1 }
  0x12   : > { %475 = vmatpush.msk.msra.mxu1 %vm236_vm0, %v218_v2  ;;  %477 = vmatpush.msk.msra.mxu3 %vm236_vm0, %v218_v2 }
  0x13   : > { %469 = vmatmul.msk.f32.vlgmr.msra.gmra.mxu1 %vm223_vm1, %v220_v3  ;;  %471 = vmatmul.msk.f32.vlgmr.msra.gmra.mxu3 %vm223_vm1, %v222_v4 }
  0x8e   : > { %v257_v5 = vpop.f32.mrf.mxu0 }
  0x8f   : > { %333 = vst.msk [vmem:[%s210_s4] sm:$0xff] %vm269_vm2, %v257_v5  ;;  %v270_v6 = vsel %vm269_vm2, %v257_v5, 0.0  ;;  %v304_v7 = vmul.f32 %v257_v5, %v257_v5 }
  0x90   : > { %271 = vadd.xlane.f32.xlu0 %v270_v6  ;;  %v260_v8 = vpop.f32.mrf.mxu1 }
  0x91   : > { %v308_v9 = vsel %vm269_vm2, %v304_v7, 0.0  ;;  %334 = vst.msk [vmem:[%s210_s4 + $0x8] sm:$0xff] %vm269_vm2, %v260_v8  ;;  %v305_v10 = vmul.f32 %v260_v8, %v260_v8  ;;  %v273_v13 = vsel %vm269_vm2, %v260_v8, 0.0 }
  0x92   : > { %309 = vadd.xlane.f32.xlu1 %v308_v9 }
  0x93   : > { %v311_v15 = vsel %vm269_vm2, %v305_v10, 0.0 }
  0x94   : > { %v263_v11 = vpop.f32.mrf.mxu2 }
  0x95   : > { %335 = vst.msk [vmem:[%s210_s4 + $0x10] sm:$0xff] %vm269_vm2, %v263_v11  ;;  %v276_v12 = vsel %vm269_vm2, %v263_v11, 0.0  ;;  %v306_v16 = vmul.f32 %v263_v11, %v263_v11 }
  0x96   : > { %277 = vadd.xlane.f32.xlu2 %v276_v12  ;;  %v266_v14 = vpop.f32.mrf.mxu3 }
  0x97   : > { %336 = vst.msk [vmem:[%s210_s4 + $0x18] sm:$0xff] %vm269_vm2, %v266_v14  ;;  %v307_v17 = vmul.f32 %v266_v14, %v266_v14  ;;  %v314_v18 = vsel %vm269_vm2, %v306_v16, 0.0  ;;  %v279_v19 = vsel %vm269_vm2, %v266_v14, 0.0 }
  0x98   : > { %274 = vadd.xlane.f32.xlu0 %v273_v13 }
  0x99   : > { %v317_v20 = vsel %vm269_vm2, %v307_v17, 0.0 }
  0x9a   : > { %312 = vadd.xlane.f32.xlu1 %v311_v15 }
  0x9e   : > { %315 = vadd.xlane.f32.xlu2 %v314_v18 }
  0xa0   : > { %280 = vadd.xlane.f32.xlu0 %v279_v19 }
  0xa2   : > { %318 = vadd.xlane.f32.xlu1 %v317_v20 }
 0x103   : > { %v272_v21 = vpop.xlane.xlu0 %271 }
 0x104   : > { %v288_v31 = vperm.slane %v272_v21, %v287_v24 }
 0x105   : > { %v310_v23 = vpop.xlane.xlu1 %309 }
 0x106   : > { %v324_v39 = vperm.slane %v310_v23, %v287_v24 }
 0x109   : > { %v278_v25 = vpop.xlane.xlu2 %277 }
 0x10a   : > { %v294_v33 = vperm.slane %v278_v25, %v293_v28 }
 0x10b   : > { %v275_v27 = vpop.xlane.xlu0 %274 }
 0x10c   : > { %v290_v30 = vperm.slane %v275_v27, %v289_v26 }
 0x10d   : > { %v313_v29 = vpop.xlane.xlu1 %312 }
 0x10e   : > { %v292_v35 = vsel %vm291_vm3, %v290_v30, %v288_v31  ;;  %v325_v36 = vperm.slane %v313_v29, %v289_v26 }
 0x10f   : > { %v296_v41 = vsel %vm295_vm4, %v294_v33, %v292_v35 }
 0x110   : > { %v326_v43 = vsel %vm291_vm3, %v325_v36, %v324_v39 }
 0x111   : > { %v316_v34 = vpop.xlane.xlu2 %315 }
 0x112   : > { %v327_v37 = vperm.slane %v316_v34, %v293_v28 }
 0x113   : > { %v281_v38 = vpop.xlane.xlu0 %280 }
 0x114   : > { %v298_v40 = vperm.slane %v281_v38, %v297_v32  ;;  %v328_v46 = vsel %vm295_vm4, %v327_v37, %v326_v43 }
 0x115   : > { %v319_v42 = vpop.xlane.xlu1 %318 }
 0x116   : > { %v300_v44 = vsel %vm299_vm5, %v298_v40, %v296_v41  ;;  %v329_v45 = vperm.slane %v319_v42, %v297_v32 }
 0x117   : > { %303 = vst.msk [vmem:[%s217_s8] sm:$0x1] %vm302_vm6, %v300_v44 }
 0x118   : > { %v330_v47 = vsel %vm299_vm5, %v329_v45, %v328_v46 }
 0x119   : > { %332 = vst.msk [vmem:[%s217_s8 + $0x1] sm:$0x1] %vm302_vm6, %v330_v47 }
 0x11a PF: > { %s14_s14 = sadd.s32 1, %s524_s14   ;;  %s617_s12 = smov %s520_s13 }
 0x11b   : > { %p11_p5 = scmp.ge.s32.totalorder %s14_s14, 4   ;;  %s618_s13 = smov %s620_s15 }
 0x11d   :  { %13 = sbr.rel (!%p11_p5) target bundleno = 2 (0x2), region = 70 }

// kernel: mlp_net_forward.5
= control target key start
LH: loop header
LB: loop body
LE: loop exit
PB: predicated region body
PF: predicated region fallthrough
CT: control target
= control target key end

     0   :  { %s508_s12 = smov 0   ;;  %s510_s13 = smov 0   ;;  %s621_s0 = inlined_call_operand.vmem [shape: f32[2,64,16], index: 0, kind: input, shape index: {}]   ;;  %s622_s1 = inlined_call_operand.vmem [shape: f32[64,1], index: 1, kind: input, shape index: {}]   ;;  %s623_s2 = inlined_call_operand.vmem [shape: f32[64,1], index: 2, kind: input, shape index: {}]   ;;  %s624_s3 = inlined_call_operand.vmem [shape: f32[2,64,16], index: 3, kind: output, shape index: {}]  }
   0x1   :  { %s512_s14 = smov 0  }
   0x2 LB: > { %s25_s15 = sadd.s32 1, %s481_s13  ;;  %p426_p0 = scmp.ge.s32.totalorder %s485_s14, 1  ;;  %s485_s14 = sphi %s512_s14, %s13_s14   ;;  %s481_s13 = sphi %s510_s13, %s626_s13   ;;  %s477_s12 = sphi %s508_s12, %s625_s12  }
   0x3   : > { %p27_p1 = scmp.ge.s32.totalorder %s25_s15, 2  ;;  %p156_p2 = scmp.lt.s32.totalorder %s485_s14, 3 }
   0x5   : > { %s628_s15 = smov (%p27_p1, %s25_s15), 0  ;;  %p157_p3 = pnand %p426_p0, %p156_p2 }
   0x6   : > { %p186_p4 = scmp.lt.s32.totalorder (!%p157_p3), %s477_s12, 1 }
   0x7   : > { %160 = sbr.rel (%p157_p3) target bundleno = 175 (0xaf), region = 32 }
   0xc   : > { %v214_v0 = vld [vmem:[%s622_s1 + $0x20] sm:$0xff]  ;;  %v212_v1 = vld [vmem:[%s622_s1 + $0x10] sm:$0xff]  ;;  %v487_v3 = vmov 0   ;;  %v215_v4 = vld [vmem:[%s622_s1 + $0x28] sm:$0xff]  ;;  %s630_s12 = smov (!%p186_p4, %s477_s12), 1  ;;  %vm330_vm0 = vcmask 130048  }
   0xd   : > { %v210_v2 = vld [vmem:[%s622_s1] sm:$0xff]  ;;  %462 = vset.pattern.permute.xlu2 %v487_v3  ;;  %461 = vset.pattern.permute.xlu1 %v487_v3  ;;  %v213_v5 = vld [vmem:[%s622_s1 + $0x18] sm:$0xff]  ;;  %v211_v6 = vld [vmem:[%s622_s1 + $0x8] sm:$0xff]  ;;  %s433_s25 = sshll.u32 %s630_s12, 6 }
   0xe   : > { %460 = vset.pattern.permute.xlu0 %v487_v3  ;;  %240 = vperm.xlu2 %462, %v214_v0   ;;  %v266_v7 = vld [vmem:[%s623_s2] sm:$0xff]  ;;  %v217_v8 = vld [vmem:[%s622_s1 + $0x38] sm:$0xff]  ;;  %v216_v9 = vld [vmem:[%s622_s1 + $0x30] sm:$0xff]  ;;  %s581_s28 = scalar_lea.vmem %s621_s0, %s433_s25  ;;  %s587_s4 = scalar_lea.vmem %s624_s3, %s433_s25 }
   0xf   : > { %230 = vperm.xlu1 %461, %v212_v1   ;;  %220 = vperm.xlu0 %460, %v210_v2   ;;  %v269_v10 = vld [vmem:[%s623_s2 + $0x18] sm:$0xff]  ;;  %v268_v11 = vld [vmem:[%s623_s2 + $0x10] sm:$0xff]  ;;  %v267_v12 = vld [vmem:[%s623_s2 + $0x8] sm:$0xff] }
  0x10   : > { %v272_v13 = vld [vmem:[%s623_s2 + $0x30] sm:$0xff]  ;;  %v271_v14 = vld [vmem:[%s623_s2 + $0x28] sm:$0xff]  ;;  %v270_v15 = vld [vmem:[%s623_s2 + $0x20] sm:$0xff] }
  0x11   : > { %v273_v16 = vld [vmem:[%s623_s2 + $0x38] sm:$0xff]  ;;  %v202_v20 = vld [vmem:[%s581_s28] sm:$0xff]  ;;  %v208_v33 = vld [vmem:[%s581_s28 + $0x30] sm:$0xff] }
  0x12   : > { %v205_v26 = vld [vmem:[%s581_s28 + $0x18] sm:$0xff]  ;;  %v204_v39 = vld [vmem:[%s581_s28 + $0x10] sm:$0xff]  ;;  %v203_v40 = vld [vmem:[%s581_s28 + $0x8] sm:$0xff] }
  0x13   : > { %v206_v50 = vld [vmem:[%s581_s28 + $0x20] sm:$0xff]  ;;  %v207_v51 = vld [vmem:[%s581_s28 + $0x28] sm:$0xff]  ;;  %v209_v60 = vld [vmem:[%s581_s28 + $0x38] sm:$0xff] }
  0x16   : > { %245 = vperm.xlu2 %462, %v215_v4  }
  0x17   : > { %235 = vperm.xlu1 %461, %v213_v5   ;;  %225 = vperm.xlu0 %460, %v211_v6  }
  0x1e   : > { %276 = vperm.xlu2 %462, %v266_v7  }
  0x1f   : > { %255 = vperm.xlu1 %461, %v217_v8   ;;  %250 = vperm.xlu0 %460, %v216_v9  }
  0x26   : > { %291 = vperm.xlu2 %462, %v269_v10  }
  0x27   : > { %286 = vperm.xlu1 %461, %v268_v11   ;;  %281 = vperm.xlu0 %460, %v267_v12  }
  0x2e   : > { %306 = vperm.xlu2 %462, %v272_v13  }
  0x2f   : > { %301 = vperm.xlu1 %461, %v271_v14   ;;  %296 = vperm.xlu0 %460, %v270_v15  }
  0x37   : > { %311 = vperm.xlu0 %460, %v273_v16  }
  0x68   : > { %v241_v17 = vpop.permute.xlu2 %240 }
  0x69   : > { %v262_v52 = vmul.f32 %v241_v17, %v206_v50 }
  0x70   : > { %v246_v18 = vpop.permute.xlu2 %245 }
  0x71   : > { %v263_v53 = vmul.f32 %v246_v18, %v207_v51 }
  0x78   : > { %v277_v19 = vpop.permute.xlu2 %276 }
  0x80   : > { %v292_v27 = vpop.permute.xlu2 %291 }
  0x81   : > { %v231_v21 = vpop.permute.xlu1 %230  ;;  %v221_v22 = vpop.permute.xlu0 %220 }
  0x82   : > { %v258_v23 = vmul.f32 %v221_v22, %v202_v20  ;;  %v260_v42 = vmul.f32 %v231_v21, %v204_v39 }
  0x84   : > { %v314_v24 = vadd.f32 %v277_v19, %v258_v23 }
  0x86   : > { %v322_v25 = vmax.f32 %v314_v24, 0.0 }
  0x88   : > { %331 = vst.msk [vmem:[%s587_s4] sm:$0xff] %vm330_vm0, %v322_v25  ;;  %v307_v37 = vpop.permute.xlu2 %306 }
  0x89   : > { %v236_v28 = vpop.permute.xlu1 %235  ;;  %v226_v29 = vpop.permute.xlu0 %225 }
  0x8a   : > { %v261_v30 = vmul.f32 %v236_v28, %v205_v26  ;;  %v259_v43 = vmul.f32 %v226_v29, %v203_v40 }
  0x8c   : > { %v317_v31 = vadd.f32 %v292_v27, %v261_v30 }
  0x8e   : > { %v325_v32 = vmax.f32 %v317_v31, 0.0 }
  0x90   : > { %334 = vst.msk [vmem:[%s587_s4 + $0x18] sm:$0xff] %vm330_vm0, %v325_v32 }
  0x91   : > { %v256_v34 = vpop.permute.xlu1 %255  ;;  %v251_v35 = vpop.permute.xlu0 %250 }
  0x92   : > { %v264_v36 = vmul.f32 %v251_v35, %v208_v33  ;;  %v265_v61 = vmul.f32 %v256_v34, %v209_v60 }
  0x94   : > { %v320_v38 = vadd.f32 %v307_v37, %v264_v36 }
  0x96   : > { %v328_v41 = vmax.f32 %v320_v38, 0.0 }
  0x98   : > { %337 = vst.msk [vmem:[%s587_s4 + $0x30] sm:$0xff] %vm330_vm0, %v328_v41 }
  0x99   : > { %v287_v44 = vpop.permute.xlu1 %286  ;;  %v282_v45 = vpop.permute.xlu0 %281 }
  0x9a   : > { %v316_v46 = vadd.f32 %v287_v44, %v260_v42  ;;  %v315_v47 = vadd.f32 %v282_v45, %v259_v43 }
  0x9c   : > { %v324_v48 = vmax.f32 %v316_v46, 0.0  ;;  %v323_v49 = vmax.f32 %v315_v47, 0.0 }
  0x9e   : > { %333 = vst.msk [vmem:[%s587_s4 + $0x10] sm:$0xff] %vm330_vm0, %v324_v48 }
  0x9f   : > { %332 = vst.msk [vmem:[%s587_s4 + $0x8] sm:$0xff] %vm330_vm0, %v323_v49 }
  0xa1   : > { %v302_v54 = vpop.permute.xlu1 %301  ;;  %v297_v55 = vpop.permute.xlu0 %296 }
  0xa2   : > { %v319_v56 = vadd.f32 %v302_v54, %v263_v53  ;;  %v318_v57 = vadd.f32 %v297_v55, %v262_v52 }
  0xa4   : > { %v327_v58 = vmax.f32 %v319_v56, 0.0  ;;  %v326_v59 = vmax.f32 %v318_v57, 0.0 }
  0xa6   : > { %336 = vst.msk [vmem:[%s587_s4 + $0x28] sm:$0xff] %vm330_vm0, %v327_v58 }
  0xa7   : > { %335 = vst.msk [vmem:[%s587_s4 + $0x20] sm:$0xff] %vm330_vm0, %v326_v59 }
  0xa9   : > { %v312_v62 = vpop.permute.xlu0 %311 }
  0xaa   : > { %v321_v63 = vadd.f32 %v312_v62, %v265_v61 }
  0xac   : > { %v329_v0 = vmax.f32 %v321_v63, 0.0 }
  0xae   : > { %338 = vst.msk [vmem:[%s587_s4 + $0x38] sm:$0xff] %vm330_vm0, %v329_v0 }
  0xaf PF: > { %s13_s14 = sadd.s32 1, %s485_s14   ;;  %s625_s12 = smov %s481_s13 }
  0xb0   : > { %p10_p5 = scmp.ge.s32.totalorder %s13_s14, 4   ;;  %s626_s13 = smov %s628_s15 }
  0xb2   :  { %12 = sbr.rel (!%p10_p5) target bundleno = 2 (0x2), region = 62 }

// kernel: mlp_net_forward.4
= control target key start
LH: loop header
LB: loop body
LE: loop exit
PB: predicated region body
PF: predicated region fallthrough
CT: control target
= control target key end

     0   :  { %s786_s18 = smov 0   ;;  %s788_s19 = smov 0   ;;  %s937_s0 = inlined_call_operand.vmem [shape: f32[2,32,16], index: 0, kind: input, shape index: {}]   ;;  %s938_s1 = inlined_call_operand.vmem [shape: f32[64,32], index: 1, kind: input, shape index: {}]   ;;  %s939_s2 = inlined_call_operand.vmem [shape: f32[32,1], index: 2, kind: input, shape index: {}]   ;;  %s940_s3 = inlined_call_operand.vmem [shape: f32[32,1], index: 3, kind: input, shape index: {}]   ;;  %s941_s4 = inlined_call_operand.vmem [shape: f32[2,64,16], index: 4, kind: output, shape index: {0}]   ;;  %s942_s5 = inlined_call_operand.vmem [shape: f32[2,1,2,64], index: 5, kind: output, shape index: {1}]  }
   0x1   :  { %s790_s20 = smov 0  }
   0x2 LB: > { %s28_s21 = sadd.s32 1, %s749_s19  ;;  %p673_p0 = scmp.ge.s32.totalorder %s753_s20, 1  ;;  %s753_s20 = sphi %s790_s20, %s16_s20   ;;  %s749_s19 = sphi %s788_s19, %s944_s19   ;;  %s745_s18 = sphi %s786_s18, %s943_s18  }
   0x3   : > { %p30_p1 = scmp.ge.s32.totalorder %s28_s21, 2  ;;  %p211_p2 = scmp.lt.s32.totalorder %s753_s20, 3 }
   0x5   : > { %s946_s21 = smov (%p30_p1, %s28_s21), 0  ;;  %p212_p3 = pnand %p673_p0, %p211_p2 }
   0x6   : > { %p252_p4 = scmp.lt.s32.totalorder (!%p212_p3), %s745_s18, 1 }
   0x7   : > { %215 = sbr.rel (%p212_p3) target bundleno = 441 (0x1b9), region = 36 }
   0xc   : > { %v310_v0 = vld [vmem:[%s940_s3 + $0x18] sm:$0xff]  ;;  %v755_v2 = vmov 0   ;;  %v309_v3 = vld [vmem:[%s940_s3 + $0x10] sm:$0xff]  ;;  %v280_v5 = vld [vmem:[%s939_s2 + $0x8] sm:$0xff]  ;;  %s948_s18 = smov (!%p252_p4, %s745_s18), 1  ;;  %vm347_vm0 = vcmask 261120  }
   0xd   : > { %v282_v1 = vld [vmem:[%s939_s2 + $0x18] sm:$0xff]  ;;  %729 = vset.pattern.permute.xlu1 %v755_v2  ;;  %728 = vset.pattern.permute.xlu0 %v755_v2  ;;  %v281_v4 = vld [vmem:[%s939_s2 + $0x10] sm:$0xff]  ;;  %v279_v6 = vld [vmem:[%s939_s2] sm:$0xff]  ;;  %s689_s13 = sshll.u32 %s948_s18, 5  ;;  %s690_s12 = sshll.u32 %s948_s18, 6  ;;  %vm413_vm1 = vcmask 130048  }
   0xe   : > { %328 = vperm.xlu1 %729, %v310_v0   ;;  %300 = vperm.xlu0 %728, %v282_v1   ;;  %v308_v7 = vld [vmem:[%s940_s3 + $0x8] sm:$0xff]  ;;  %v307_v8 = vld [vmem:[%s940_s3] sm:$0xff]  ;;  %s259_s16 = scalar_lea.vmem %s937_s0, %s689_s13  ;;  %v341_v34 = vld [vmem:[%s938_s1 + $0x10] sm:$0xff]  ;;  %s874_s15 = scalar_lea.vmem %s941_s4, %s690_s12  ;;  %vm451_vm2 = vcmask 130112   ;;  %vm455_vm3 = vcmask 195712   ;;  %vm459_vm4 = vcmask 261312  }
   0xf   : > { %730 = vset.pattern.permute.xlu2 %v755_v2  ;;  %v278_v9 = vld [vmem:[%s259_s16 + $0x18] sm:$0xff]  ;;  %v277_v16 = vld [vmem:[%s259_s16 + $0x10] sm:$0xff]  ;;  %v276_v21 = vld [vmem:[%s259_s16 + $0x8] sm:$0xff]  ;;  %vm463_vm5 = vcmask 326912   ;;  %vm467_vm6 = vcmask 392512   ;;  %vm471_vm7 = vcmask 458112  }
  0x10   : > { %323 = vperm.xlu2 %730, %v309_v3   ;;  %v275_v23 = vld [vmem:[%s259_s16] sm:$0xff]  ;;  %v345_v36 = vld [vmem:[%s938_s1 + $0x30] sm:$0xff]  ;;  %v340_v37 = vld [vmem:[%s938_s1 + $0x8] sm:$0xff]  ;;  %s678_s16 = sshll.u32 %s948_s18, 1  ;;  %vm475_vm8 = vcmask 523712   ;;  %vm478_vm9 = vcmask 516096  }
  0x11   : > { %v339_v33 = vld [vmem:[%s938_s1] sm:$0xff]  ;;  %v342_v38 = vld [vmem:[%s938_s1 + $0x18] sm:$0xff]  ;;  %v344_v39 = vld [vmem:[%s938_s1 + $0x28] sm:$0xff]  ;;  %s274_s23 = scalar_lea.vmem %s942_s5, %s678_s16 }
  0x12   : > { %v343_v35 = vld [vmem:[%s938_s1 + $0x20] sm:$0xff]  ;;  %v346_v40 = vld [vmem:[%s938_s1 + $0x38] sm:$0xff] }
  0x16   : > { %295 = vperm.xlu0 %728, %v281_v4   ;;  %290 = vperm.xlu1 %729, %v280_v5  }
  0x18   : > { %285 = vperm.xlu2 %730, %v279_v6  }
  0x1e   : > { %318 = vperm.xlu0 %728, %v308_v7   ;;  %313 = vperm.xlu1 %729, %v307_v8  }
  0x6a   : > { %v324_v13 = vpop.permute.xlu2 %323 }
  0x72   : > { %v286_v22 = vpop.permute.xlu2 %285 }
  0x73   : > { %v303_v26 = vmul.f32 %v286_v22, %v275_v23 }
  0x80   : > { %v329_v10 = vpop.permute.xlu1 %328  ;;  %v301_v11 = vpop.permute.xlu0 %300 }
  0x81   : > { %v306_v12 = vmul.f32 %v301_v11, %v278_v9 }
  0x83   : > { %v334_v14 = vadd.f32 %v329_v10, %v306_v12 }
  0x85   : > { %v338_v15 = vmax.f32 %v334_v14, 0.0 }
  0x87   : > { %384 = vmatpush.msra.mxu0 %v338_v15  ;;  %691 = vmatpush.msra.mxu1 %v338_v15 }
  0x88   : > { %692 = vmatpush.msra.mxu2 %v338_v15  ;;  %693 = vmatpush.msra.mxu3 %v338_v15  ;;  %v296_v17 = vpop.permute.xlu0 %295  ;;  %v291_v18 = vpop.permute.xlu1 %290  ;;  %v446_v15 = vlaneseq }
  0x89   : > { %v305_v19 = vmul.f32 %v296_v17, %v277_v16  ;;  %v304_v25 = vmul.f32 %v291_v18, %v276_v21 }
  0x8a   : > { %v447_v17 = vand.u32 127, %v446_v15 }
  0x8b   : > { %v333_v20 = vadd.f32 %v324_v13, %v305_v19 }
  0x8c   : > { %v449_v19 = vadd.s32 4294967288, %v447_v17  ;;  %v453_v22 = vadd.s32 4294967280, %v447_v17 }
  0x8d   : > { %v337_v24 = vmax.f32 %v333_v20, 0.0 }
  0x8f   : > { %385 = vmatpush.msra.mxu0 %v337_v24  ;;  %694 = vmatpush.msra.mxu1 %v337_v24 }
  0x90   : > { %695 = vmatpush.msra.mxu2 %v337_v24  ;;  %696 = vmatpush.msra.mxu3 %v337_v24  ;;  %v319_v27 = vpop.permute.xlu0 %318  ;;  %v314_v28 = vpop.permute.xlu1 %313  ;;  %v457_v24 = vadd.s32 4294967272, %v447_v17 }
  0x91   : > { %v332_v29 = vadd.f32 %v319_v27, %v304_v25  ;;  %v331_v30 = vadd.f32 %v314_v28, %v303_v26 }
  0x93   : > { %v336_v31 = vmax.f32 %v332_v29, 0.0  ;;  %v335_v32 = vmax.f32 %v331_v30, 0.0  ;;  %v461_v30 = vadd.s32 4294967264, %v447_v17 }
  0x95   : > { %386 = vmatpush.msra.mxu0 %v336_v31  ;;  %697 = vmatpush.msra.mxu1 %v336_v31 }
  0x96   : > { %698 = vmatpush.msra.mxu2 %v336_v31  ;;  %699 = vmatpush.msra.mxu3 %v336_v31 }
  0x97   : > { %387 = vmatpush.msra.mxu0 %v335_v32  ;;  %700 = vmatpush.msra.mxu1 %v335_v32 }
  0x98   : > { %701 = vmatpush.msra.mxu2 %v335_v32  ;;  %702 = vmatpush.msra.mxu3 %v335_v32 }
  0x99   : > { %679 = vmatmul.msk.f32.vlgmr.msra.gmra.mxu0 %vm347_vm0, %v339_v33  ;;  %681 = vmatmul.msk.f32.vlgmr.msra.gmra.mxu1 %vm347_vm0, %v341_v34 }
  0x9a   : > { %683 = vmatmul.msk.f32.vlgmr.msra.gmra.mxu2 %vm347_vm0, %v343_v35  ;;  %685 = vmatmul.msk.f32.vlgmr.msra.gmra.mxu3 %vm347_vm0, %v345_v36  ;;  %v469_v35 = vadd.s32 4294967248, %v447_v17  ;;  %v465_v36 = vadd.s32 4294967256, %v447_v17 }
  0xa1   : > { %680 = vmatmul.msk.f32.gmra.mxu0 %vm347_vm0, %v340_v37  ;;  %682 = vmatmul.msk.f32.gmra.mxu1 %vm347_vm0, %v342_v38  ;;  %v473_v38 = vadd.s32 4294967240, %v447_v17 }
  0xa2   : > { %684 = vmatmul.msk.f32.gmra.mxu2 %vm347_vm0, %v344_v39  ;;  %686 = vmatmul.msk.f32.gmra.mxu3 %vm347_vm0, %v346_v40 }
 0x116   : > { %v389_v41 = vpop.f32.mrf.mxu0  ;;  %v395_v42 = vpop.f32.mrf.mxu1 }
 0x117   : > { %537 = vst.msk [vmem:[%s874_s15] sm:$0xff] %vm413_vm1, %v389_v41  ;;  %v414_v43 = vsel %vm413_vm1, %v389_v41, 0.0  ;;  %v482_v44 = vmul.f32 %v395_v42, %v395_v42  ;;  %v480_v45 = vmul.f32 %v389_v41, %v389_v41  ;;  %v420_v50 = vsel %vm413_vm1, %v395_v42, 0.0 }
 0x118   : > { %539 = vst.msk [vmem:[%s874_s15 + $0x10] sm:$0xff] %vm413_vm1, %v395_v42  ;;  %415 = vadd.xlane.f32.xlu2 %v414_v43 }
 0x119   : > { %v494_v46 = vsel %vm413_vm1, %v482_v44, 0.0  ;;  %v488_v47 = vsel %vm413_vm1, %v480_v45, 0.0 }
 0x11a   : > { %495 = vadd.xlane.f32.xlu0 %v494_v46  ;;  %489 = vadd.xlane.f32.xlu1 %v488_v47 }
 0x11d   : > { %v401_v48 = vpop.f32.mrf.mxu2  ;;  %v407_v49 = vpop.f32.mrf.mxu3 }
 0x11e   : > { %541 = vst.msk [vmem:[%s874_s15 + $0x20] sm:$0xff] %vm413_vm1, %v401_v48  ;;  %v392_v51 = vpop.f32.mrf.mxu0  ;;  %v426_v52 = vsel %vm413_vm1, %v401_v48, 0.0  ;;  %v432_v53 = vsel %vm413_vm1, %v407_v49, 0.0  ;;  %v398_v54 = vpop.f32.mrf.mxu1  ;;  %v484_v0 = vmul.f32 %v401_v48, %v401_v48  ;;  %v486_v7 = vmul.f32 %v407_v49, %v407_v49 }
 0x11f   : > { %543 = vst.msk [vmem:[%s874_s15 + $0x30] sm:$0xff] %vm413_vm1, %v407_v49  ;;  %v481_v55 = vmul.f32 %v392_v51, %v392_v51  ;;  %v423_v59 = vsel %vm413_vm1, %v398_v54, 0.0  ;;  %v483_v60 = vmul.f32 %v398_v54, %v398_v54  ;;  %v417_v61 = vsel %vm413_vm1, %v392_v51, 0.0 }
 0x120   : > { %421 = vadd.xlane.f32.xlu2 %v420_v50  ;;  %538 = vst.msk [vmem:[%s874_s15 + $0x8] sm:$0xff] %vm413_vm1, %v392_v51  ;;  %v500_v2 = vsel %vm413_vm1, %v484_v0, 0.0  ;;  %v506_v8 = vsel %vm413_vm1, %v486_v7, 0.0 }
 0x121   : > { %540 = vst.msk [vmem:[%s874_s15 + $0x18] sm:$0xff] %vm413_vm1, %v398_v54  ;;  %v491_v56 = vsel %vm413_vm1, %v481_v55, 0.0  ;;  %v497_v63 = vsel %vm413_vm1, %v483_v60, 0.0 }
 0x122   : > { %427 = vadd.xlane.f32.xlu0 %v426_v52  ;;  %433 = vadd.xlane.f32.xlu1 %v432_v53 }
 0x125   : > { %v404_v57 = vpop.f32.mrf.mxu2  ;;  %v410_v58 = vpop.f32.mrf.mxu3 }
 0x126   : > { %542 = vst.msk [vmem:[%s874_s15 + $0x28] sm:$0xff] %vm413_vm1, %v404_v57  ;;  %v485_v62 = vmul.f32 %v404_v57, %v404_v57  ;;  %v487_v3 = vmul.f32 %v410_v58, %v410_v58  ;;  %v429_v4 = vsel %vm413_vm1, %v404_v57, 0.0  ;;  %v435_v5 = vsel %vm413_vm1, %v410_v58, 0.0 }
 0x127   : > { %544 = vst.msk [vmem:[%s874_s15 + $0x38] sm:$0xff] %vm413_vm1, %v410_v58 }
 0x128   : > { %492 = vadd.xlane.f32.xlu2 %v491_v56  ;;  %v503_v1 = vsel %vm413_vm1, %v485_v62, 0.0  ;;  %v509_v6 = vsel %vm413_vm1, %v487_v3, 0.0 }
 0x12a   : > { %424 = vadd.xlane.f32.xlu1 %v423_v59  ;;  %418 = vadd.xlane.f32.xlu0 %v417_v61 }
 0x130   : > { %498 = vadd.xlane.f32.xlu2 %v497_v63 }
 0x132   : > { %501 = vadd.xlane.f32.xlu1 %v500_v2  ;;  %504 = vadd.xlane.f32.xlu0 %v503_v1 }
 0x138   : > { %430 = vadd.xlane.f32.xlu2 %v429_v4 }
 0x13a   : > { %436 = vadd.xlane.f32.xlu0 %v435_v5  ;;  %510 = vadd.xlane.f32.xlu1 %v509_v6 }
 0x140   : > { %507 = vadd.xlane.f32.xlu2 %v506_v8 }
 0x18b   : > { %v416_v9 = vpop.xlane.xlu2 %415 }
 0x18c   : > { %v448_v23 = vperm.slane %v416_v9, %v447_v17 }
 0x18d   : > { %v496_v10 = vpop.xlane.xlu0 %495  ;;  %v490_v11 = vpop.xlane.xlu1 %489 }
 0x18e   : > { %v520_v34 = vperm.slane %v490_v11, %v447_v17  ;;  %v523_v43 = vperm.slane %v496_v10, %v453_v22 }
 0x193   : > { %v422_v12 = vpop.xlane.xlu2 %421 }
 0x194   : > { %v454_v27 = vperm.slane %v422_v12, %v453_v22 }
 0x195   : > { %v428_v13 = vpop.xlane.xlu0 %427  ;;  %v434_v14 = vpop.xlane.xlu1 %433 }
 0x196   : > { %v462_v39 = vperm.slane %v428_v13, %v461_v30  ;;  %v470_v45 = vperm.slane %v434_v14, %v469_v35 }
 0x19b   : > { %v493_v16 = vpop.xlane.xlu2 %492 }
 0x19c   : > { %v521_v31 = vperm.slane %v493_v16, %v449_v19 }
 0x19d   : > { %v419_v18 = vpop.xlane.xlu0 %418  ;;  %v425_v20 = vpop.xlane.xlu1 %424 }
 0x19e   : > { %v450_v21 = vperm.slane %v419_v18, %v449_v19  ;;  %v458_v29 = vperm.slane %v425_v20, %v457_v24  ;;  %v522_v40 = vsel %vm451_vm2, %v521_v31, %v520_v34 }
 0x19f   : > { %v524_v48 = vsel %vm455_vm3, %v523_v43, %v522_v40 }
 0x1a0   : > { %v452_v26 = vsel %vm451_vm2, %v450_v21, %v448_v23 }
 0x1a1   : > { %v456_v32 = vsel %vm455_vm3, %v454_v27, %v452_v26 }
 0x1a2   : > { %v460_v37 = vsel %vm459_vm4, %v458_v29, %v456_v32 }
 0x1a3   : > { %v499_v25 = vpop.xlane.xlu2 %498  ;;  %v464_v46 = vsel %vm463_vm5, %v462_v39, %v460_v37 }
 0x1a4   : > { %v525_v41 = vperm.slane %v499_v25, %v457_v24 }
 0x1a5   : > { %v505_v28 = vpop.xlane.xlu0 %504  ;;  %v502_v33 = vpop.xlane.xlu1 %501 }
 0x1a6   : > { %v527_v49 = vperm.slane %v502_v33, %v461_v30  ;;  %v526_v52 = vsel %vm459_vm4, %v525_v41, %v524_v48  ;;  %v529_v56 = vperm.slane %v505_v28, %v465_v36 }
 0x1a8   : > { %v528_v57 = vsel %vm463_vm5, %v527_v49, %v526_v52 }
 0x1a9   : > { %v530_v61 = vsel %vm467_vm6, %v529_v56, %v528_v57 }
 0x1ab   : > { %v431_v42 = vpop.xlane.xlu2 %430 }
 0x1ac   : > { %v466_v44 = vperm.slane %v431_v42, %v465_v36 }
 0x1ad   : > { %v437_v47 = vpop.xlane.xlu0 %436  ;;  %v511_v55 = vpop.xlane.xlu1 %510 }
 0x1ae   : > { %v468_v50 = vsel %vm467_vm6, %v466_v44, %v464_v46  ;;  %v474_v51 = vperm.slane %v437_v47, %v473_v38  ;;  %v533_v59 = vperm.slane %v511_v55, %v473_v38 }
 0x1af   : > { %v472_v53 = vsel %vm471_vm7, %v470_v45, %v468_v50 }
 0x1b0   : > { %v476_v54 = vsel %vm475_vm8, %v474_v51, %v472_v53 }
 0x1b1   : > { %479 = vst.msk [vmem:[%s274_s23] sm:$0x1] %vm478_vm9, %v476_v54 }
 0x1b3   : > { %v508_v58 = vpop.xlane.xlu2 %507 }
 0x1b4   : > { %v531_v60 = vperm.slane %v508_v58, %v469_v35 }
 0x1b6   : > { %v532_v62 = vsel %vm471_vm7, %v531_v60, %v530_v61 }
 0x1b7   : > { %v534_v63 = vsel %vm475_vm8, %v533_v59, %v532_v62 }
 0x1b8   : > { %536 = vst.msk [vmem:[%s274_s23 + $0x1] sm:$0x1] %vm478_vm9, %v534_v63 }
 0x1b9 PF: > { %s16_s20 = sadd.s32 1, %s753_s20   ;;  %s943_s18 = smov %s749_s19 }
 0x1ba   : > { %p13_p5 = scmp.ge.s32.totalorder %s16_s20, 4   ;;  %s944_s19 = smov %s946_s21 }
 0x1bc   :  { %15 = sbr.rel (!%p13_p5) target bundleno = 2 (0x2), region = 78 }

</bundles_post_ra>
